<compile_context>
chip_gen: v7x
topology: tpu7x:2x2x1
jax: 0.10.0
libtpu: 0.0.40
codegen_flags: <defaults>
</compile_context>

<pallas_src>
import jax
import jax.numpy as jnp
from jax.experimental import pallas as pl
from jax.experimental.pallas import tpu as pltpu


def _conv1x1_kernel(x_ref, w1_ref, b1_ref, w2_ref, b2_ref, o_ref):
    # x_ref:  (R_in,  T)      R_in = P*C rows (P whole images), spatial on lanes
    # w1_ref: (R_mid, R_in)   block-diagonal conv1 weight, BN1 scale folded
    # b1_ref: (R_mid, 1)      folded BN1 shift (tiled per image)
    # w2_ref: (R_in,  R_mid)  block-diagonal conv2 weight, BN2 scale folded
    # b2_ref: (R_in,  1)      folded BN2 shift (tiled per image)
    # o_ref:  (R_in,  T)
    x = x_ref[...].astype(jnp.float32)

    # conv1 (+ folded BN1): small-K contraction on the MXU, spatial on lanes.
    h = jnp.dot(w1_ref[...], x, preferred_element_type=jnp.float32) + b1_ref[...]
    h = jnp.maximum(h, 0.0)

    # conv2 (+ folded BN2).
    y = jnp.dot(w2_ref[...], h, preferred_element_type=jnp.float32) + b2_ref[...]

    o_ref[...] = y.astype(o_ref.dtype)


def _pick_rows(n, c):
    """Images per block P: smallest P with P | N and P*C a multiple of 8."""
    for p in range(1, n + 1):
        if n % p == 0 and (p * c) % 8 == 0:
            return p
    # TODO(synk): if N*C can't be grouped into multiple-of-8 row blocks, use the
    # full row extent (always a legal block); block-diag weight grows with N.
    return n


def _pick_tile_cols(hw, max_cols):
    """Largest lane-dense (multiple-of-128) tile width dividing hw, capped.

    Returns the full extent if hw <= max_cols, or None if hw must be padded."""
    if hw <= max_cols:
        return hw
    best = None
    for t in range(128, max_cols + 1, 128):
        if hw % t == 0:
            best = t
    return best


def conv1x1_forward(x_nchw, w1, w2, bn1_params, bn2_params, *, eps=1e-3,
                    max_tile_cols=2048):
    """Fused Conv1x1 -> BN1 -> ReLU -> Conv1x1 -> BN2 (eval-mode BN).

    x_nchw: (N, C, H, W)   w1: (C_mid, C)   w2: (C, C_mid)
    bn*_params: (gamma, beta, running_mean, running_var)
    """
    N, C, H, W = x_nchw.shape
    C_mid = w1.shape[0]
    HW = H * W

    # Fold BatchNorm (eval mode) into the weights / a per-channel shift.
    g1, be1, m1, v1 = bn1_params
    g2, be2, m2, v2 = bn2_params
    s1 = (g1 / jnp.sqrt(v1 + eps)).astype(jnp.float32)
    b1 = (be1 - m1 * s1).astype(jnp.float32)
    s2 = (g2 / jnp.sqrt(v2 + eps)).astype(jnp.float32)
    b2 = (be2 - m2 * s2).astype(jnp.float32)
    w1s = w1.astype(jnp.float32) * s1[:, None]        # (C_mid, C)
    w2s = w2.astype(jnp.float32) * s2[:, None]        # (C, C_mid)

    # Pack P whole images per row block (full 8-sublane tiles for C=4 -> P=2).
    # The per-image conv becomes one block-diagonal matmul per block.
    P = _pick_rows(N, C)
    R_in = P * C
    R_mid = P * C_mid
    eye = jnp.eye(P, dtype=jnp.float32)
    w1b = jnp.kron(eye, w1s)                           # (R_mid, R_in) block-diag
    w2b = jnp.kron(eye, w2s)                           # (R_in, R_mid) block-diag
    b1b = jnp.tile(b1.reshape(C_mid, 1), (P, 1))       # (R_mid, 1)
    b2b = jnp.tile(b2.reshape(C, 1), (P, 1))           # (R_in, 1)

    # Free (contiguous) reshape -- no transpose, no extra HBM pass.
    x2 = x_nchw.reshape(N * C, HW)

    tile_cols = _pick_tile_cols(HW, max_tile_cols)
    hw_pad = HW
    if tile_cols is None:
        # Ragged spatial extent larger than the cap: pad the lane axis up to a
        # tile multiple (keeps VMEM bounded on every generation), slice after.
        tile_cols = max_tile_cols
        hw_pad = ((HW + tile_cols - 1) // tile_cols) * tile_cols
        x2 = jnp.pad(x2, ((0, 0), (0, hw_pad - HW)))

    grid = (N * C // R_in, hw_pad // tile_cols)
    full = lambda i, j: (0, 0)

    out = pl.pallas_call(
        _conv1x1_kernel,
        out_shape=jax.ShapeDtypeStruct((N * C, hw_pad), x_nchw.dtype),
        grid_spec=pltpu.PrefetchScalarGridSpec(
            num_scalar_prefetch=0,
            grid=grid,
            in_specs=[
                pl.BlockSpec((R_in, tile_cols), lambda i, j: (i, j)),  # x
                pl.BlockSpec((R_mid, R_in), full),                     # W1 (folded)
                pl.BlockSpec((R_mid, 1), full),                        # b1
                pl.BlockSpec((R_in, R_mid), full),                     # W2 (folded)
                pl.BlockSpec((R_in, 1), full),                         # b2
            ],
            out_specs=pl.BlockSpec((R_in, tile_cols), lambda i, j: (i, j)),
        ),
        compiler_params=pltpu.CompilerParams(
            dimension_semantics=("parallel", "parallel"),
            vmem_limit_bytes=32 * 1024 * 1024,
        ),
    )(x2, w1b, b1b, w2b, b2b)

    if hw_pad != HW:
        out = out[:, :HW]
    return out.reshape(N, C, H, W)


def _reference(x_nchw, w1, w2, bn1_params, bn2_params, eps=1e-3):
    """Plain-JAX reference (eval-mode BN) for correctness checking."""
    g1, be1, m1, v1 = bn1_params
    g2, be2, m2, v2 = bn2_params
    x = jnp.einsum("nchw,oc->nohw", x_nchw, w1)
    x = (x - m1[None, :, None, None]) / jnp.sqrt(v1[None, :, None, None] + eps)
    x = x * g1[None, :, None, None] + be1[None, :, None, None]
    x = jnp.maximum(x, 0.0)
    x = jnp.einsum("nchw,oc->nohw", x, w2)
    x = (x - m2[None, :, None, None]) / jnp.sqrt(v2[None, :, None, None] + eps)
    x = x * g2[None, :, None, None] + be2[None, :, None, None]
    return x


if __name__ == "__main__":
    # Small shapes consistent with the module: inchannl=4, ratio=4.
    N, C, H, W = 2, 4, 16, 16
    ratio = 4
    C_mid = C * ratio

    key = jax.random.PRNGKey(0)
    kx, kw1, kw2, kg1, kb1, km1, kv1, kg2, kb2, km2, kv2 = jax.random.split(key, 11)

    x = jax.random.normal(kx, (N, C, H, W), dtype=jnp.float32)

    # Conv weights (kernel_size=1, bias=False) -> (out, in).
    w1 = 0.1 * jax.random.normal(kw1, (C_mid, C), dtype=jnp.float32)
    w2 = 0.1 * jax.random.normal(kw2, (C, C_mid), dtype=jnp.float32)

    # BatchNorm parameters (eval-mode running stats), deterministic nonzero.
    bn1 = (1.0 + 0.1 * jax.random.normal(kg1, (C_mid,), jnp.float32),
           0.1 * jax.random.normal(kb1, (C_mid,), jnp.float32),
           0.1 * jax.random.normal(km1, (C_mid,), jnp.float32),
           1.0 + 0.5 * jax.random.uniform(kv1, (C_mid,), jnp.float32))
    bn2 = (1.0 + 0.1 * jax.random.normal(kg2, (C,), jnp.float32),
           0.1 * jax.random.normal(kb2, (C,), jnp.float32),
           0.1 * jax.random.normal(km2, (C,), jnp.float32),
           1.0 + 0.5 * jax.random.uniform(kv2, (C,), jnp.float32))

    y = conv1x1_forward(x, w1, w2, bn1, bn2)
    y = jax.block_until_ready(y)

    y_ref = _reference(x, w1, w2, bn1, bn2)
    assert y.shape == (N, C, H, W)
    assert jnp.allclose(y, y_ref, atol=1e-4, rtol=1e-4), "mismatch vs reference"

    # TODO(synk): training-mode BatchNorm (batch statistics) not implemented;
    # this kernel folds eval-mode running stats into the weights/shifts.
    print("KERNEL_OK")
</pallas_src>

<mosaic_0001>
module attributes {stable_mosaic.version = 11 : i64} {
  func.func @_conv1x1_kernel(%arg0: i32, %arg1: i32, %arg2: memref<8x256xf32, #tpu.memory_space<vmem>>, %arg3: memref<32x8xf32, #tpu.memory_space<vmem>>, %arg4: memref<32x1xf32, #tpu.memory_space<vmem>>, %arg5: memref<8x32xf32, #tpu.memory_space<vmem>>, %arg6: memref<8x1xf32, #tpu.memory_space<vmem>>, %arg7: memref<8x256xf32, #tpu.memory_space<vmem>>) attributes {dimension_semantics = [#tpu.dimension_semantics<parallel>, #tpu.dimension_semantics<parallel>], iteration_bounds = array<i64: 1, 1>, scalar_prefetch = 0 : i64, scratch_operands = 0 : i64, tpu.core_type = #tpu.core_type<tc>, window_params = [{transform_indices = @transform_0, window_bounds = array<i64: 8, 256>}, {pipeline_mode = #tpu.pipeline_mode<synchronous>, transform_indices = @transform_1, window_bounds = array<i64: 32, 8>}, {pipeline_mode = #tpu.pipeline_mode<synchronous>, transform_indices = @transform_2, window_bounds = array<i64: 32, 1>}, {pipeline_mode = #tpu.pipeline_mode<synchronous>, transform_indices = @transform_3, window_bounds = array<i64: 8, 32>}, {pipeline_mode = #tpu.pipeline_mode<synchronous>, transform_indices = @transform_4, window_bounds = array<i64: 8, 1>}, {transform_indices = @transform_5, window_bounds = array<i64: 8, 256>}]} {
    %c0 = arith.constant 0 : index
    %c0_0 = arith.constant 0 : index
    %0 = vector.load %arg2[%c0, %c0_0] : memref<8x256xf32, #tpu.memory_space<vmem>>, vector<8x256xf32>
    %c0_1 = arith.constant 0 : index
    %c0_2 = arith.constant 0 : index
    %1 = vector.load %arg3[%c0_1, %c0_2] : memref<32x8xf32, #tpu.memory_space<vmem>>, vector<32x8xf32>
    %cst = arith.constant dense<0.000000e+00> : vector<32x256xf32>
    %2 = tpu.matmul %1, %0, %cst {dimension_numbers = #tpu.dot_dimension_numbers<[1], [0], [0], [1], [0, 0, 1, 1], [], []>} : vector<32x8xf32>, vector<8x256xf32>, vector<32x256xf32> -> vector<32x256xf32>
    %c0_3 = arith.constant 0 : index
    %c0_4 = arith.constant 0 : index
    %3 = vector.load %arg4[%c0_3, %c0_4] : memref<32x1xf32, #tpu.memory_space<vmem>>, vector<32x1xf32>
    %4 = vector.broadcast %3 : vector<32x1xf32> to vector<32x256xf32>
    %5 = arith.addf %2, %4 : vector<32x256xf32>
    %cst_5 = arith.constant 0.000000e+00 : f32
    %6 = vector.broadcast %cst_5 : f32 to vector<32x256xf32>
    %7 = arith.maximumf %5, %6 : vector<32x256xf32>
    %c0_6 = arith.constant 0 : index
    %c0_7 = arith.constant 0 : index
    %8 = vector.load %arg5[%c0_6, %c0_7] : memref<8x32xf32, #tpu.memory_space<vmem>>, vector<8x32xf32>
    %cst_8 = arith.constant dense<0.000000e+00> : vector<8x256xf32>
    %9 = tpu.matmul %8, %7, %cst_8 {dimension_numbers = #tpu.dot_dimension_numbers<[1], [0], [0], [1], [0, 0, 1, 1], [], []>} : vector<8x32xf32>, vector<32x256xf32>, vector<8x256xf32> -> vector<8x256xf32>
    %c0_9 = arith.constant 0 : index
    %c0_10 = arith.constant 0 : index
    %10 = vector.load %arg6[%c0_9, %c0_10] : memref<8x1xf32, #tpu.memory_space<vmem>>, vector<8x1xf32>
    %11 = vector.broadcast %10 : vector<8x1xf32> to vector<8x256xf32>
    %12 = arith.addf %9, %11 : vector<8x256xf32>
    %c0_11 = arith.constant 0 : index
    %c0_12 = arith.constant 0 : index
    %13 = vector.load %arg7[%c0_11, %c0_12] : memref<8x256xf32, #tpu.memory_space<vmem>>, vector<8x256xf32>
    tpu.vector_store %arg7[%c0_11, %c0_12], %12 {strides = array<i32>} : memref<8x256xf32, #tpu.memory_space<vmem>>, vector<8x256xf32>,
    return
  }
  func.func @transform_0(%arg0: i32, %arg1: i32) -> (i32, i32) {
    %c0_i32 = arith.constant 0 : i32
    return %arg0, %arg1 : i32, i32
  }
  func.func @transform_1(%arg0: i32, %arg1: i32) -> (i32, i32) {
    %c0_i32 = arith.constant 0 : i32
    %c0_i32_0 = arith.constant 0 : i32
    %c0_i32_1 = arith.constant 0 : i32
    return %c0_i32, %c0_i32_0 : i32, i32
  }
  func.func @transform_2(%arg0: i32, %arg1: i32) -> (i32, i32) {
    %c0_i32 = arith.constant 0 : i32
    %c0_i32_0 = arith.constant 0 : i32
    %c0_i32_1 = arith.constant 0 : i32
    return %c0_i32, %c0_i32_0 : i32, i32
  }
  func.func @transform_3(%arg0: i32, %arg1: i32) -> (i32, i32) {
    %c0_i32 = arith.constant 0 : i32
    %c0_i32_0 = arith.constant 0 : i32
    %c0_i32_1 = arith.constant 0 : i32
    return %c0_i32, %c0_i32_0 : i32, i32
  }
  func.func @transform_4(%arg0: i32, %arg1: i32) -> (i32, i32) {
    %c0_i32 = arith.constant 0 : i32
    %c0_i32_0 = arith.constant 0 : i32
    %c0_i32_1 = arith.constant 0 : i32
    return %c0_i32, %c0_i32_0 : i32, i32
  }
  func.func @transform_5(%arg0: i32, %arg1: i32) -> (i32, i32) {
    %c0_i32 = arith.constant 0 : i32
    return %arg0, %arg1 : i32, i32
  }
}

</mosaic_0001>

<bundles_post_ra>
// kernel: tpu_custom_call.1
= control target key start
LH: loop header
LB: loop body
LE: loop exit
PB: predicated region body
PF: predicated region fallthrough
CT: control target
= control target key end

     0   :  { %vm51_vm0 = vcmask 64512   ;;  %v301_v3 = vmov 0.0   ;;  %v302_v4 = vmov 0   ;;  %s386_s0 = inlined_call_operand.vmem [shape: f32[8,256], index: 0, kind: input, shape index: {}]   ;;  %s387_s1 = inlined_call_operand.vmem [shape: f32[32,8], index: 1, kind: input, shape index: {}]   ;;  %s388_s2 = inlined_call_operand.vmem [shape: f32[32,1], index: 2, kind: input, shape index: {}]   ;;  %s389_s3 = inlined_call_operand.vmem [shape: f32[8,32], index: 3, kind: input, shape index: {}]   ;;  %s390_s4 = inlined_call_operand.vmem [shape: f32[8,1], index: 4, kind: input, shape index: {}]   ;;  %s391_s5 = inlined_call_operand.hbm [shape: f32[8,256], index: 5, kind: output, shape index: {}]  }
   0x1   :  { %v22_v0 = vld [vmem:[%s386_s0 + $0x8] sm:$0xff]  ;;  %v21_v1 = vld [vmem:[%s386_s0] sm:$0xff]  ;;  %128 = vmatprep.mubr.f32.mxu0 %v301_v3  ;;  %275 = vset.pattern.permute.xlu0 %v302_v4  ;;  %v29_v6 = vld [vmem:[%s388_s2 + $0x10] sm:$0xff] }
   0x2   :  { %v23_v2 = vld [vmem:[%s387_s1] sm:$0xff]  ;;  %64 = vmatprep.subr.mxu0 %v22_v0 }
   0x3   :  { %65 = vmatpush1.msra.mxu0 %v21_v1  ;;  %v27_v5 = vld [vmem:[%s388_s2] sm:$0xff] }
   0x4   :  { %259 = vmatmul.mubr.msk.f32.vlgmr.msra.gmra.mrb[0].mxu0 %vm51_vm0, %v23_v2  ;;  %33 = vperm.xlu0 %275, %v27_v5  }
   0x5   :  { %10 = vsyncpa [#allocation3], 0  ;;  %134 = vmatprep.mubr.f32.mxu0 %v301_v3  ;;  %v24_v7 = vld [vmem:[%s387_s1 + $0x8] sm:$0xff]  ;;  %276 = vset.pattern.permute.xlu1 %v302_v4  ;;  %v30_v9 = vld [vmem:[%s388_s2 + $0x18] sm:$0xff]  ;;  %vm168_vm1 = vcmask 261120  }
   0x6   :  { %v28_v8 = vld [vmem:[%s388_s2 + $0x8] sm:$0xff]  ;;  %43 = vperm.xlu1 %276, %v29_v6   ;;  %236 = vmatprep.mubr.f32.mxu1 %v301_v3  ;;  %v25_v10 = vld [vmem:[%s387_s1 + $0x10] sm:$0xff]  ;;  %v162_v11 = vld [vmem:[%s390_s4] sm:$0xff]  ;;  %s303_s4 = smov [#allocation2]  }
   0x7   :  { %v26_v12 = vld [vmem:[%s387_s1 + $0x18] sm:$0xff]  ;;  %v161_v45 = vld [vmem:[%s389_s3] sm:$0xff]  ;;  %s251_s14 = sshll.u32 %s303_s4, 4  ;;  %s252_s14 = int_to_ptr.vmem [resolvable:$true] %s251_s14 }
   0x8   :  { %260 = vmatmul.mubr.msk.f32.gmra.mrb[2].mxu0 %vm51_vm0, %v24_v7  ;;  %38 = vperm.xlu0 %275, %v28_v8   ;;  %s277_s15 = scalar_lea.vmem %s252_s14, 256  ;;  %p282_p1 = scmp.lt.s32.totalorder %s252_s14, %s252_s14 }
   0x9   :  { %140 = vmatprep.mubr.f32.mxu0 %v301_v3  ;;  %p278_p0 = scmp.ne.s32.totalorder %s252_s14, %s277_s15  ;;  %p283_p2 = scmp.lt.s32.totalorder %s277_s15, %s277_s15 }
   0xa   :  { %48 = vperm.xlu1 %276, %v30_v9  }
   0xb   :  { %p284_p3 = por %p283_p2, %p282_p1 }
   0xc   :  { %261 = vmatmul.mubr.msk.f32.gmra.mrb[4].mxu0 %vm51_vm0, %v25_v10  ;;  %165 = vperm.xlu0 %275, %v162_v11  }
   0xd   :  { %146 = vmatprep.mubr.f32.mxu0 %v301_v3  ;;  %p285_p4 = pnand %p284_p3, %p278_p0 }
  0x10   :  { %262 = vmatmul.mubr.msk.f32.gmra.mrb[6].mxu0 %vm51_vm0, %v26_v12 }
  0x83   :  { %v34_v13 = vpop.permute.xlu0 %33 }
  0x85   :  { %v44_v22 = vpop.permute.xlu1 %43 }
  0x87   :  { %v39_v17 = vpop.permute.xlu0 %38 }
  0x89   :  { %v49_v33 = vpop.permute.xlu1 %48 }
  0x8b   :  { %v166_v46 = vpop.permute.xlu0 %165 }
  0xd7   :  { %v130_v14 = vpop.f32.mrb[0].mxu0 }
  0xd8   :  { %v132_v15 = vpop.f32.mrb[1].mxu0  ;;  %v131_v16 = vadd.f32 %v130_v14, %v34_v13 }
  0xd9   :  { %v133_v18 = vadd.f32 %v132_v15, %v34_v13 }
  0xda   :  { %v153_v24 = vmax.f32 %v131_v16, 0.0 }
  0xdb   :  { %v136_v19 = vpop.f32.mrb[2].mxu0  ;;  %v154_v26 = vmax.f32 %v133_v18, 0.0 }
  0xdc   :  { %v137_v20 = vadd.f32 %v136_v19, %v39_v17  ;;  %v138_v21 = vpop.f32.mrb[3].mxu0 }
  0xdd   :  { %v139_v23 = vadd.f32 %v138_v21, %v39_v17 }
  0xde   :  { %v155_v25 = vmax.f32 %v137_v20, 0.0 }
  0xdf   :  { %v156_v27 = vmax.f32 %v139_v23, 0.0  ;;  %v142_v28 = vpop.f32.mrb[4].mxu0 }
  0xe0   :  { %v144_v29 = vpop.f32.mrb[5].mxu0  ;;  %v266_v30 = vpack.c.bf16 %v155_v25, %v153_v24  ;;  %v143_v32 = vadd.f32 %v142_v28, %v44_v22 }
  0xe1   :  { %v264_v31 = vpack.c.bf16 %v156_v27, %v154_v26  ;;  %v145_v34 = vadd.f32 %v144_v29, %v44_v22 }
  0xe2   :  { %v157_v39 = vmax.f32 %v143_v32, 0.0 }
  0xe3   :  { %v148_v35 = vpop.f32.mrb[6].mxu0  ;;  %265 = vmatprep.subr.bf16.mxu1 %v264_v31  ;;  %v158_v41 = vmax.f32 %v145_v34, 0.0 }
  0xe4   :  { %v149_v36 = vadd.f32 %v148_v35, %v49_v33  ;;  %v150_v37 = vpop.f32.mrb[7].mxu0  ;;  %267 = vmatpush1.bf16.msra.mxu1 %v266_v30 }
  0xe5   :  { %v151_v38 = vadd.f32 %v150_v37, %v49_v33 }
  0xe6   :  { %v159_v40 = vmax.f32 %v149_v36, 0.0 }
  0xe7   :  { %v160_v42 = vmax.f32 %v151_v38, 0.0 }
  0xe8   :  { %v270_v43 = vpack.c.bf16 %v159_v40, %v157_v39 }
  0xe9   :  { %v268_v44 = vpack.c.bf16 %v160_v42, %v158_v41 }
  0xeb   :  { %269 = vmatprep.subr.bf16.mxu1 %v268_v44 }
  0xec   :  { %271 = vmatpush1.bf16.msra.mxu1 %v270_v43 }
  0xef   :  { %263 = vmatmul.mubr.msk.f32.vlgmr.msra.gmra.mrb[0].mxu1 %vm168_vm1, %v161_v45 }
 0x1c2   :  { %v238_v47 = vpop.f32.mrb[0].mxu1 }
 0x1c3   :  { %v239_v48 = vadd.f32 %v238_v47, %v166_v46  ;;  %v240_v49 = vpop.f32.mrb[1].mxu1 }
 0x1c4   :  { %v241_v50 = vadd.f32 %v240_v49, %v166_v46 }
 0x1c5   :  { %243 = vst [vmem:[#allocation2] sm:$0xff] %v239_v48 }
 0x1c6   :  { %244 = vst [vmem:[#allocation2 + $0x8] sm:$0xff] %v241_v50 }
 0x1c7   :  { %288 = shalt.err (!%p285_p4)
}
 0x1c8   :  { %s289_s17 = scalar_lea.hbm %s391_s5, 256 }
 0x1c9   :  { %p290_p5 = scmp.ne.s32.totalorder %s391_s5, %s289_s17  ;;  %p293_p6 = scmp.lt.u32.totalorder %s289_s17, %s391_s5 }
 0x1cb   :  { %p295_p7 = pnand %p293_p6, %p290_p5 }
 0x1cd   :  { %298 = shalt.err (!%p295_p7)
}
 0x1ce   :  { %254 = dma.vmem_to_hbm [thread:$0]  %s252_s14, 256, %s391_s5, [#allocation3]  }
 0x1cf   :  { %299 = dma.done.wait [#allocation3], 256  }
 0x1d0   :  { %300 = vsyncadd [#allocation3], 4294967040 }
 0x1d1   :  { %258 = vsyncpa [#allocation3], 1 }

</bundles_post_ra>
